<compile_context>
chip_gen: v5e
topology: v5e:2x2
jax: 0.10.0
libtpu: 0.0.40
codegen_flags: <defaults>
</compile_context>

<pallas_src>
import jax
import jax.numpy as jnp
from jax.experimental import pallas as pl
from jax.experimental.pallas import tpu as pltpu


LANES = 128                 # f32 vreg lane width
DEFAULT_TILE_ROWS = 512     # 512 * 128 * 4 B = 256 KiB per f32 tile


def _round_up(x, m):
    return ((x + m - 1) // m) * m


def perceptron_kernel(w_ref, b_ref, x_ref, o_ref):
    # w_ref, b_ref: (1, 1) scalars in SMEM; x_ref/o_ref: (tile_rows, 128) VMEM tiles.
    w = w_ref[0, 0]
    b = b_ref[0, 0]
    # Compute in f32 (safe on v5e even if I/O is ever bf16).
    z = x_ref[...].astype(jnp.float32) * w + b
    # sigmoid(z) = 1 / (1 + exp(-z)); exp -> EUP, approx reciprocal -> EUP.
    sig = pl.reciprocal(1.0 + jnp.exp(-z), approx=True)
    o_ref[...] = sig.astype(o_ref.dtype)


def perceptron_forward(x, w, b, *, tile_rows=None):
    """x: (N, 1), w: (1, 1), b: (1, 1) -> (N, 1), same dtype as x."""
    N, F = x.shape
    assert F == 1, "Perceptron expects a single input feature (Linear(1, 1))."

    # Lane-dense view: (N, 1) -> padded (rows_padded, 128).
    rows = pl.cdiv(N, LANES)
    if tile_rows is None:
        tile_rows = min(DEFAULT_TILE_ROWS, _round_up(rows, 8))
    tile_rows = max(8, _round_up(tile_rows, 8))      # respect (8, 128) tiling
    rows_padded = _round_up(rows, tile_rows)
    total_padded = rows_padded * LANES

    x_flat = x.reshape(N)
    if total_padded != N:
        x_flat = jnp.pad(x_flat, (0, total_padded - N))
    x2d = x_flat.reshape(rows_padded, LANES)

    grid = (rows_padded // tile_rows,)
    itemsize = jnp.dtype(x.dtype).itemsize

    out2d = pl.pallas_call(
        perceptron_kernel,
        out_shape=jax.ShapeDtypeStruct((rows_padded, LANES), x.dtype),
        grid=grid,
        in_specs=[
            pl.BlockSpec(memory_space=pltpu.SMEM),            # w (scalar)
            pl.BlockSpec(memory_space=pltpu.SMEM),            # b (scalar)
            pl.BlockSpec((tile_rows, LANES), lambda i: (i, 0)),  # x tile
        ],
        out_specs=pl.BlockSpec((tile_rows, LANES), lambda i: (i, 0)),
        compiler_params=pltpu.CompilerParams(
            dimension_semantics=("parallel",)),
        cost_estimate=pl.CostEstimate(
            flops=2 * N,
            transcendentals=N,
            bytes_accessed=2 * N * itemsize),
    )(w, b, x2d)

    # Slice the padding back off and restore the (N, 1) module layout.
    return out2d.reshape(total_padded)[:N].reshape(N, 1)


if __name__ == "__main__":
    key = jax.random.PRNGKey(0)
    kx, kw, kb = jax.random.split(key, 3)

    # Small batch of scalar inputs, shape (N, 1) — consistent with Linear(1, 1).
    N = 8
    x = jax.random.normal(kx, (N, 1), dtype=jnp.float32)

    # Deterministic parameter init (PyTorch Linear(1,1) uses U(-1, 1); fan_in=1).
    w = jax.random.uniform(kw, (1, 1), dtype=jnp.float32, minval=-1.0, maxval=1.0)
    b = jax.random.uniform(kb, (1, 1), dtype=jnp.float32, minval=-1.0, maxval=1.0)

    out = jax.block_until_ready(perceptron_forward(x, w, b))
    ref = jax.nn.sigmoid(x * w[0, 0] + b[0, 0])
    assert out.shape == (N, 1)
    assert jnp.allclose(out, ref, atol=2e-3, rtol=2e-3), "mismatch vs reference"

    # Exercise the multi-tile (grid > 1) path plus padding/slice-back with a
    # non-multiple-of-128 batch and a deliberately small tile.
    N2 = 2048 + 37
    x2 = jax.random.normal(kx, (N2, 1), dtype=jnp.float32)
    out2 = jax.block_until_ready(perceptron_forward(x2, w, b, tile_rows=8))
    ref2 = jax.nn.sigmoid(x2 * w[0, 0] + b[0, 0])
    assert out2.shape == (N2, 1)
    assert jnp.allclose(out2, ref2, atol=2e-3, rtol=2e-3), "mismatch vs reference (tiled)"

    print("KERNEL_OK")
</pallas_src>

<mosaic_0001>
module attributes {stable_mosaic.version = 11 : i64} {
  func.func @perceptron_kernel(%arg0: i32, %arg1: memref<1x1xf32, #tpu.memory_space<smem>>, %arg2: memref<1x1xf32, #tpu.memory_space<smem>>, %arg3: memref<8x128xf32, #tpu.memory_space<vmem>>, %arg4: memref<8x128xf32, #tpu.memory_space<vmem>>) attributes {dimension_semantics = [#tpu.dimension_semantics<parallel>], iteration_bounds = array<i64: 1>, scalar_prefetch = 0 : i64, scratch_operands = 0 : i64, tpu.core_type = #tpu.core_type<tc>, window_params = [{transform_indices = @transform_0, window_bounds = array<i64: 1, 1>}, {transform_indices = @transform_1, window_bounds = array<i64: 1, 1>}, {transform_indices = @transform_2, window_bounds = array<i64: 8, 128>}, {transform_indices = @transform_3, window_bounds = array<i64: 8, 128>}]} {
    %c0 = arith.constant 0 : index
    %c0_0 = arith.constant 0 : index
    %0 = memref.load %arg1[%c0, %c0_0] : memref<1x1xf32, #tpu.memory_space<smem>>
    %c0_1 = arith.constant 0 : index
    %c0_2 = arith.constant 0 : index
    %1 = memref.load %arg2[%c0_1, %c0_2] : memref<1x1xf32, #tpu.memory_space<smem>>
    %c0_3 = arith.constant 0 : index
    %c0_4 = arith.constant 0 : index
    %2 = vector.load %arg3[%c0_3, %c0_4] : memref<8x128xf32, #tpu.memory_space<vmem>>, vector<8x128xf32>
    %3 = vector.broadcast %0 : f32 to vector<8x128xf32>
    %4 = arith.mulf %2, %3 : vector<8x128xf32>
    %5 = vector.broadcast %1 : f32 to vector<8x128xf32>
    %6 = arith.addf %4, %5 : vector<8x128xf32>
    %cst = arith.constant 0.000000e+00 : f32
    %7 = vector.broadcast %cst : f32 to vector<8x128xf32>
    %8 = arith.subf %7, %6 : vector<8x128xf32>
    %9 = math.exp %8 : vector<8x128xf32>
    %cst_5 = arith.constant 1.000000e+00 : f32
    %10 = vector.broadcast %cst_5 : f32 to vector<8x128xf32>
    %11 = arith.addf %10, %9 : vector<8x128xf32>
    %12 = tpu.reciprocal %11 {approx = true} : vector<8x128xf32> -> vector<8x128xf32>
    %c0_6 = arith.constant 0 : index
    %c0_7 = arith.constant 0 : index
    %13 = vector.load %arg4[%c0_6, %c0_7] : memref<8x128xf32, #tpu.memory_space<vmem>>, vector<8x128xf32>
    tpu.vector_store %arg4[%c0_6, %c0_7], %12 {strides = array<i32>} : memref<8x128xf32, #tpu.memory_space<vmem>>, vector<8x128xf32>,
    return
  }
  func.func @transform_0(%arg0: i32) -> (i32, i32) {
    %c0_i32 = arith.constant 0 : i32
    %c0_i32_0 = arith.constant 0 : i32
    %c0_i32_1 = arith.constant 0 : i32
    return %c0_i32, %c0_i32_0 : i32, i32
  }
  func.func @transform_1(%arg0: i32) -> (i32, i32) {
    %c0_i32 = arith.constant 0 : i32
    %c0_i32_0 = arith.constant 0 : i32
    %c0_i32_1 = arith.constant 0 : i32
    return %c0_i32, %c0_i32_0 : i32, i32
  }
  func.func @transform_2(%arg0: i32) -> (i32, i32) {
    %c0_i32 = arith.constant 0 : i32
    %c0_i32_0 = arith.constant 0 : i32
    return %arg0, %c0_i32 : i32, i32
  }
  func.func @transform_3(%arg0: i32) -> (i32, i32) {
    %c0_i32 = arith.constant 0 : i32
    %c0_i32_0 = arith.constant 0 : i32
    return %arg0, %c0_i32 : i32, i32
  }
}

</mosaic_0001>

<bundles_post_ra>
// kernel: tpu_custom_call.1
= control target key start
LH: loop header
LB: loop body
LE: loop exit
PB: predicated region body
PF: predicated region fallthrough
CT: control target
= control target key end

     0   :  { %10 = vsyncpa [#allocation5], 0  ;;  %s153_s0 = inlined_call_operand.<no memory space> [shape: f32[1,1], index: 0, kind: input, shape index: {}]   ;;  %s154_s1 = inlined_call_operand.<no memory space> [shape: f32[1,1], index: 1, kind: input, shape index: {}]   ;;  %s155_s2 = inlined_call_operand.hbm [shape: f32[8,128], index: 2, kind: input, shape index: {}]   ;;  %s156_s3 = inlined_call_operand.hbm [shape: f32[8,128], index: 3, kind: output, shape index: {}]  }
   0x1   :  { %11 = vsyncpa [#allocation6], 0  ;;  %s21_s14 = sshll.u32 %s155_s2, 4  ;;  %s119_s15 = smov [#allocation4]   ;;  %s22_s14 = int_to_ptr.hbm [resolvable:$true] %s21_s14 }
   0x2   :  { %s23_s16 = sshll.u32 %s119_s15, 4  ;;  %s24_s16 = int_to_ptr.vmem [resolvable:$true] %s23_s16 }
   0x3   :  { %26 = dma.hbm_to_vmem [thread:$0]  %s22_s14, 128, %s24_s16, [#allocation5]  }
   0x4   :  { %115 = dma.done.wait [#allocation5], 128  }
   0x5   :  { %116 = vsyncadd [#allocation5], 4294967168  ;;  %v34_v0 = vstv %s153_s0  ;;  %v33_v1 = vld [vmem:[#allocation4] sm:$0xff]  ;;  %v36_v2 = vstv %s154_s1  ;;  %s120_s2 = smov [#allocation7]   ;;  %s51_s24 = sshll.u32 %s156_s3, 4  ;;  %s52_s24 = int_to_ptr.hbm [resolvable:$true] %s51_s24 }
   0x6   :  { %v35_v3 = vmul.f32 %v34_v0, %v33_v1  ;;  %s49_s21 = sshll.u32 %s120_s2, 4  ;;  %s50_s21 = int_to_ptr.vmem [resolvable:$true] %s49_s21 }
   0x8   :  { %v37_v4 = vadd.f32 %v36_v2, %v35_v3 }
   0xa   :  { %v38_v5 = vsub.f32 0.0, %v37_v4 }
   0xc   :  { %v39_v6 = vmul.f32 1.442695, %v38_v5 }
   0xe   :  { %63 = vpow2.f32 %v39_v6 }
  0x14   :  { %v64_v7 = vpop.eup %63 }
  0x15   :  { %v41_v8 = vadd.f32 1.0, %v64_v7 }
  0x17   :  { %65 = vrcp.f32 %v41_v8 }
  0x1d   :  { %v66_v9 = vpop.eup %65 }
  0x1e   :  { %43 = vst [vmem:[#allocation7] sm:$0xff] %v66_v9 }
  0x1f   :  { %54 = dma.vmem_to_hbm [thread:$0]  %s50_s21, 128, %s52_s24, [#allocation6]  }
  0x20   :  { %117 = dma.done.wait [#allocation6], 128  }
  0x21   :  { %118 = vsyncadd [#allocation6], 4294967168 }
  0x22   :  { %59 = vsyncpa [#allocation5], 1 }
  0x23   :  { %60 = vsyncpa [#allocation6], 1 }

</bundles_post_ra>
